<compile_context>
chip_gen: v7x
topology: tpu7x:2x2x1
jax: 0.10.0
libtpu: 0.0.40
codegen_flags: <defaults>
</compile_context>

<pallas_src>
import functools

import jax
import jax.numpy as jnp
from jax import lax
from jax.experimental import pallas as pl
from jax.experimental.pallas import tpu as pltpu


# ----------------------------------------------------------------------------
# Kernel: Conv1d (stride=1, dilation d, symmetric zero padding) + bias.
# ----------------------------------------------------------------------------

def convnorm_kernel(x_ref, w_ref, b_ref, o_ref, xpad_scr, *, K, dilation,
                    padding):
    """One batch element per grid point.

    x_ref   : (T, Cin)          channels-last input
    w_ref   : (K, Cin, Cout)    tap-major weights
    b_ref   : (1, Cout)         bias
    o_ref   : (To, Cout)        To = T + 2*padding - dilation*(K-1)
    xpad_scr: VMEM (T + 2*padding, Cin)  zero-padded input scratch
    """
    T, Cin = x_ref.shape
    To, Cout = o_ref.shape

    # Zero the scratch once, then overwrite the interior rows; the halo rows
    # provide the conv zero-padding without any HBM-side jnp.pad.
    xpad_scr[...] = jnp.zeros_like(xpad_scr)
    xpad_scr[padding:padding + T, :] = x_ref[...]

    # K accumulated matmuls over sublane-shifted windows with static offsets.
    # K is tiny and compile-time constant, so this is a short unrolled loop of
    # MXU pushes; no lane-axis im2col concat / relayout (perf-review item).
    acc = jnp.zeros((To, Cout), jnp.float32)
    for k in range(K):
        off = k * dilation
        acc += jnp.dot(xpad_scr[off:off + To, :], w_ref[k],
                       preferred_element_type=jnp.float32)
    o_ref[...] = (acc + b_ref[...]).astype(o_ref.dtype)


# ----------------------------------------------------------------------------
# Wrapper with PyTorch Conv1d layout: signal (B, Cin, T) -> (B, Cout, To).
# ----------------------------------------------------------------------------

def conv_norm(signal, weight, bias=None, *, stride=1, padding=None, dilation=1):
    """ConvNorm.forward: Conv1d(signal) with torch layouts.

    signal: (B, Cin, T); weight: (Cout, Cin, K); bias: (Cout,) or None.
    """
    B, Cin, T = signal.shape
    Cout, Cin_w, K = weight.shape
    assert Cin_w == Cin
    if padding is None:
        assert K % 2 == 1
        padding = int(dilation * (K - 1) / 2)
    if stride != 1:
        # TODO(synk): strided Conv1d not implemented (ConvNorm defaults to 1).
        raise NotImplementedError("stride != 1 not supported")
    To = T + 2 * padding - dilation * (K - 1)
    assert To > 0

    # Channels-last for lane-dense matmuls; tap-major (K, Cin, Cout) weights.
    x = jnp.transpose(signal, (0, 2, 1)).astype(jnp.float32)    # (B, T, Cin)
    w = jnp.transpose(weight, (2, 1, 0)).astype(jnp.float32)    # (K, Cin, Cout)
    if bias is None:
        bias = jnp.zeros((Cout,), jnp.float32)
    b = bias.reshape(1, Cout).astype(jnp.float32)

    kern = functools.partial(convnorm_kernel, K=K, dilation=dilation,
                             padding=padding)
    out = pl.pallas_call(
        kern,
        grid=(B,),
        in_specs=[
            pl.BlockSpec((None, T, Cin), lambda i: (i, 0, 0)),
            pl.BlockSpec((K, Cin, Cout), lambda i: (0, 0, 0)),
            pl.BlockSpec((1, Cout), lambda i: (0, 0)),
        ],
        out_specs=pl.BlockSpec((None, To, Cout), lambda i: (i, 0, 0)),
        out_shape=jax.ShapeDtypeStruct((B, To, Cout), jnp.float32),
        scratch_shapes=[pltpu.VMEM((T + 2 * padding, Cin), jnp.float32)],
        compiler_params=pltpu.CompilerParams(
            dimension_semantics=("parallel",),
            vmem_limit_bytes=16 * 1024 * 1024),
    )(x, w, b)
    return jnp.transpose(out, (0, 2, 1))                        # (B, Cout, To)


# ----------------------------------------------------------------------------
# Parameter init matching torch.nn.init.xavier_uniform_(gain('linear')=1.0).
# ----------------------------------------------------------------------------

def init_convnorm_params(key, in_channels, out_channels, kernel_size):
    gain = 1.0                                   # calculate_gain('linear')
    fan_in = in_channels * kernel_size
    fan_out = out_channels * kernel_size
    a = gain * (6.0 / (fan_in + fan_out)) ** 0.5
    kw, kb = jax.random.split(key)
    weight = jax.random.uniform(kw, (out_channels, in_channels, kernel_size),
                                jnp.float32, -a, a)
    bound = 1.0 / (fan_in ** 0.5)                # torch Conv1d default bias
    bias = jax.random.uniform(kb, (out_channels,), jnp.float32, -bound, bound)
    return weight, bias


# ----------------------------------------------------------------------------

if __name__ == "__main__":
    B, Cin, Cout, T, K, dil = 2, 16, 32, 48, 5, 1
    key = jax.random.PRNGKey(0)
    k_x, k_p = jax.random.split(key)
    signal = jax.random.normal(k_x, (B, Cin, T), jnp.float32)
    weight, bias = init_convnorm_params(k_p, Cin, Cout, K)

    fwd = jax.jit(lambda s, w, b: conv_norm(s, w, b, dilation=dil))
    out = jax.block_until_ready(fwd(signal, weight, bias))
    assert out.shape == (B, Cout, T), out.shape
    assert bool(jnp.all(jnp.isfinite(out)))

    # Pure-JAX reference with torch.nn.Conv1d semantics ('same' padding).
    pad = dil * (K - 1) // 2
    ref = lax.conv_general_dilated(
        signal, weight, window_strides=(1,), padding=[(pad, pad)],
        rhs_dilation=(dil,), dimension_numbers=("NCH", "OIH", "NCH"),
        precision=lax.Precision.HIGHEST)
    ref = ref + bias[None, :, None]
    max_err = float(jnp.max(jnp.abs(out - ref)))
    assert bool(jnp.allclose(out, ref, atol=2e-2, rtol=2e-2)), max_err

    print("KERNEL_OK")
</pallas_src>

<mosaic_0001>
module attributes {stable_mosaic.version = 11 : i64} {
  func.func @convnorm_kernel(%arg0: i32, %arg1: memref<1x48x16xf32, #tpu.memory_space<vmem>>, %arg2: memref<5x16x32xf32, #tpu.memory_space<vmem>>, %arg3: memref<1x32xf32, #tpu.memory_space<vmem>>, %arg4: memref<1x48x32xf32, #tpu.memory_space<vmem>>, %arg5: memref<52x16xf32, #tpu.memory_space<vmem>>) attributes {dimension_semantics = [#tpu.dimension_semantics<parallel>], iteration_bounds = array<i64: 2>, scalar_prefetch = 0 : i64, scratch_operands = 1 : i64, tpu.core_type = #tpu.core_type<tc>, window_params = [{transform_indices = @transform_0, window_bounds = array<i64: 1, 48, 16>}, {pipeline_mode = #tpu.pipeline_mode<synchronous>, transform_indices = @transform_1, window_bounds = array<i64: 5, 16, 32>}, {pipeline_mode = #tpu.pipeline_mode<synchronous>, transform_indices = @transform_2, window_bounds = array<i64: 1, 32>}, {transform_indices = @transform_3, window_bounds = array<i64: 1, 48, 32>}]} {
    %cst = arith.constant 0.000000e+00 : f32
    %0 = vector.broadcast %cst : f32 to vector<52x16xf32>
    %c0 = arith.constant 0 : index
    %c0_0 = arith.constant 0 : index
    %1 = vector.load %arg5[%c0, %c0_0] : memref<52x16xf32, #tpu.memory_space<vmem>>, vector<52x16xf32>
    tpu.vector_store %arg5[%c0, %c0_0], %0 {strides = array<i32>} : memref<52x16xf32, #tpu.memory_space<vmem>>, vector<52x16xf32>,
    %c0_1 = arith.constant 0 : index
    %c0_2 = arith.constant 0 : index
    %c0_3 = arith.constant 0 : index
    %2 = vector.load %arg1[%c0_1, %c0_2, %c0_3] : memref<1x48x16xf32, #tpu.memory_space<vmem>>, vector<1x48x16xf32>
    %3 = vector.shape_cast %2 : vector<1x48x16xf32> to vector<48x16xf32>
    %c2 = arith.constant 2 : index
    %c0_4 = arith.constant 0 : index
    %4 = vector.load %arg5[%c2, %c0_4] : memref<52x16xf32, #tpu.memory_space<vmem>>, vector<48x16xf32>
    tpu.vector_store %arg5[%c2, %c0_4], %3 {strides = array<i32>} : memref<52x16xf32, #tpu.memory_space<vmem>>, vector<48x16xf32>,
    %cst_5 = arith.constant 0.000000e+00 : f32
    %5 = vector.broadcast %cst_5 : f32 to vector<48x32xf32>
    %c0_6 = arith.constant 0 : index
    %c0_7 = arith.constant 0 : index
    %6 = vector.load %arg5[%c0_6, %c0_7] : memref<52x16xf32, #tpu.memory_space<vmem>>, vector<48x16xf32>
    %c0_8 = arith.constant 0 : index
    %c0_9 = arith.constant 0 : index
    %c0_10 = arith.constant 0 : index
    %7 = vector.load %arg2[%c0_8, %c0_9, %c0_10] : memref<5x16x32xf32, #tpu.memory_space<vmem>>, vector<1x16x32xf32>
    %8 = vector.shape_cast %7 : vector<1x16x32xf32> to vector<16x32xf32>
    %cst_11 = arith.constant dense<0.000000e+00> : vector<48x32xf32>
    %9 = tpu.matmul %6, %8, %cst_11 {dimension_numbers = #tpu.dot_dimension_numbers<[1], [0], [0], [1], [0, 0, 1, 1], [], []>} : vector<48x16xf32>, vector<16x32xf32>, vector<48x32xf32> -> vector<48x32xf32>
    %10 = arith.addf %5, %9 : vector<48x32xf32>
    %c1 = arith.constant 1 : index
    %c0_12 = arith.constant 0 : index
    %11 = vector.load %arg5[%c1, %c0_12] : memref<52x16xf32, #tpu.memory_space<vmem>>, vector<48x16xf32>
    %c1_13 = arith.constant 1 : index
    %c0_14 = arith.constant 0 : index
    %c0_15 = arith.constant 0 : index
    %12 = vector.load %arg2[%c1_13, %c0_14, %c0_15] : memref<5x16x32xf32, #tpu.memory_space<vmem>>, vector<1x16x32xf32>
    %13 = vector.shape_cast %12 : vector<1x16x32xf32> to vector<16x32xf32>
    %cst_16 = arith.constant dense<0.000000e+00> : vector<48x32xf32>
    %14 = tpu.matmul %11, %13, %cst_16 {dimension_numbers = #tpu.dot_dimension_numbers<[1], [0], [0], [1], [0, 0, 1, 1], [], []>} : vector<48x16xf32>, vector<16x32xf32>, vector<48x32xf32> -> vector<48x32xf32>
    %15 = arith.addf %10, %14 : vector<48x32xf32>
    %c2_17 = arith.constant 2 : index
    %c0_18 = arith.constant 0 : index
    %16 = vector.load %arg5[%c2_17, %c0_18] : memref<52x16xf32, #tpu.memory_space<vmem>>, vector<48x16xf32>
    %c2_19 = arith.constant 2 : index
    %c0_20 = arith.constant 0 : index
    %c0_21 = arith.constant 0 : index
    %17 = vector.load %arg2[%c2_19, %c0_20, %c0_21] : memref<5x16x32xf32, #tpu.memory_space<vmem>>, vector<1x16x32xf32>
    %18 = vector.shape_cast %17 : vector<1x16x32xf32> to vector<16x32xf32>
    %cst_22 = arith.constant dense<0.000000e+00> : vector<48x32xf32>
    %19 = tpu.matmul %16, %18, %cst_22 {dimension_numbers = #tpu.dot_dimension_numbers<[1], [0], [0], [1], [0, 0, 1, 1], [], []>} : vector<48x16xf32>, vector<16x32xf32>, vector<48x32xf32> -> vector<48x32xf32>
    %20 = arith.addf %15, %19 : vector<48x32xf32>
    %c3 = arith.constant 3 : index
    %c0_23 = arith.constant 0 : index
    %21 = vector.load %arg5[%c3, %c0_23] : memref<52x16xf32, #tpu.memory_space<vmem>>, vector<48x16xf32>
    %c3_24 = arith.constant 3 : index
    %c0_25 = arith.constant 0 : index
    %c0_26 = arith.constant 0 : index
    %22 = vector.load %arg2[%c3_24, %c0_25, %c0_26] : memref<5x16x32xf32, #tpu.memory_space<vmem>>, vector<1x16x32xf32>
    %23 = vector.shape_cast %22 : vector<1x16x32xf32> to vector<16x32xf32>
    %cst_27 = arith.constant dense<0.000000e+00> : vector<48x32xf32>
    %24 = tpu.matmul %21, %23, %cst_27 {dimension_numbers = #tpu.dot_dimension_numbers<[1], [0], [0], [1], [0, 0, 1, 1], [], []>} : vector<48x16xf32>, vector<16x32xf32>, vector<48x32xf32> -> vector<48x32xf32>
    %25 = arith.addf %20, %24 : vector<48x32xf32>
    %c4 = arith.constant 4 : index
    %c0_28 = arith.constant 0 : index
    %26 = vector.load %arg5[%c4, %c0_28] : memref<52x16xf32, #tpu.memory_space<vmem>>, vector<48x16xf32>
    %c4_29 = arith.constant 4 : index
    %c0_30 = arith.constant 0 : index
    %c0_31 = arith.constant 0 : index
    %27 = vector.load %arg2[%c4_29, %c0_30, %c0_31] : memref<5x16x32xf32, #tpu.memory_space<vmem>>, vector<1x16x32xf32>
    %28 = vector.shape_cast %27 : vector<1x16x32xf32> to vector<16x32xf32>
    %cst_32 = arith.constant dense<0.000000e+00> : vector<48x32xf32>
    %29 = tpu.matmul %26, %28, %cst_32 {dimension_numbers = #tpu.dot_dimension_numbers<[1], [0], [0], [1], [0, 0, 1, 1], [], []>} : vector<48x16xf32>, vector<16x32xf32>, vector<48x32xf32> -> vector<48x32xf32>
    %30 = arith.addf %25, %29 : vector<48x32xf32>
    %c0_33 = arith.constant 0 : index
    %c0_34 = arith.constant 0 : index
    %31 = vector.load %arg3[%c0_33, %c0_34] : memref<1x32xf32, #tpu.memory_space<vmem>>, vector<1x32xf32>
    %32 = vector.broadcast %31 : vector<1x32xf32> to vector<48x32xf32>
    %33 = arith.addf %30, %32 : vector<48x32xf32>
    %c0_35 = arith.constant 0 : index
    %c0_36 = arith.constant 0 : index
    %c0_37 = arith.constant 0 : index
    %34 = vector.load %arg4[%c0_35, %c0_36, %c0_37] : memref<1x48x32xf32, #tpu.memory_space<vmem>>, vector<1x48x32xf32>
    %35 = vector.shape_cast %34 : vector<1x48x32xf32> to vector<48x32xf32>
    %36 = vector.shape_cast %33 : vector<48x32xf32> to vector<1x48x32xf32>
    tpu.vector_store %arg4[%c0_35, %c0_36, %c0_37], %36 {strides = array<i32>} : memref<1x48x32xf32, #tpu.memory_space<vmem>>, vector<1x48x32xf32>,
    return
  }
  func.func @transform_0(%arg0: i32) -> (i32, i32, i32) {
    %c0_i32 = arith.constant 0 : i32
    %c0_i32_0 = arith.constant 0 : i32
    %c0_i32_1 = arith.constant 0 : i32
    return %arg0, %c0_i32, %c0_i32_0 : i32, i32, i32
  }
  func.func @transform_1(%arg0: i32) -> (i32, i32, i32) {
    %c0_i32 = arith.constant 0 : i32
    %c0_i32_0 = arith.constant 0 : i32
    %c0_i32_1 = arith.constant 0 : i32
    %c0_i32_2 = arith.constant 0 : i32
    return %c0_i32, %c0_i32_0, %c0_i32_1 : i32, i32, i32
  }
  func.func @transform_2(%arg0: i32) -> (i32, i32) {
    %c0_i32 = arith.constant 0 : i32
    %c0_i32_0 = arith.constant 0 : i32
    %c0_i32_1 = arith.constant 0 : i32
    return %c0_i32, %c0_i32_0 : i32, i32
  }
  func.func @transform_3(%arg0: i32) -> (i32, i32, i32) {
    %c0_i32 = arith.constant 0 : i32
    %c0_i32_0 = arith.constant 0 : i32
    %c0_i32_1 = arith.constant 0 : i32
    return %arg0, %c0_i32, %c0_i32_0 : i32, i32, i32
  }
}

</mosaic_0001>

<bundles_post_ra>
// kernel: _lambda_.1
= control target key start
LH: loop header
LB: loop body
LE: loop exit
PB: predicated region body
PF: predicated region fallthrough
CT: control target
= control target key end

     0   :  { %s1132_s12 = smov 0   ;;  %s1249_s0 = inlined_call_operand.vmem [shape: f32[2,48,16], index: 0, kind: input, shape index: {}]   ;;  %s1250_s1 = inlined_call_operand.vmem [shape: f32[5,16,32], index: 1, kind: input, shape index: {}]   ;;  %s1251_s2 = inlined_call_operand.vmem [shape: f32[1,32], index: 2, kind: input, shape index: {}]   ;;  %s1252_s3 = inlined_call_operand.vmem [shape: f32[2,48,32], index: 3, kind: output, shape index: {}]  }
   0x1 LB: > { %s894_s13 = sadd.s32 4294967295, %s1109_s12   ;;  %p898_p0 = scmp.ge.s32.totalorder %s1109_s12, 1  ;;  %s1109_s12 = sphi %s1132_s12, %s13_s12  }
   0x2   : > { %p137_p1 = scmp.lt.s32.totalorder %s1109_s12, 3 }
   0x4   : > { %p138_p2 = pnand %p898_p0, %p137_p1 }
   0x5   : > { %v901_v0 = vld [vmem:[%s1250_s1 + $0x10] sm:$0xff] (!%p138_p2)  ;;  %v902_v1 = vld [vmem:[%s1250_s1 + $0x18] sm:$0xff] (!%p138_p2)  ;;  %v915_v2 = vld [vmem:[%s1250_s1 + $0x20] sm:$0xff] (!%p138_p2)  ;;  %p1149_p3 = scmp.lt.s32.totalorder (!%p138_p2), %s894_s13, 1  ;;  %vm171_vm0 = vcmask (!%p138_p2), 130048   ;;  %v1111_v5 = vmov (!%p138_p2), 0.0  }
   0x6   : > { %141 = sbr.rel (%p138_p2) target bundleno = 274 (0x112), region = 32  ;;  %v1047_v3 = vpack.c.bf16 (!%p138_p2), %v902_v1, %v901_v0  ;;  %v916_v4 = vld [vmem:[%s1250_s1 + $0x28] sm:$0xff] (!%p138_p2)  ;;  %172 = vst.msk [vmem:[#allocation2] sm:$0xff] (!%p138_p2), %vm171_vm0, %v1111_v5  ;;  %173 = vst.msk [vmem:[#allocation2 + $0x8] sm:$0xff] (!%p138_p2), %vm171_vm0, %v1111_v5  ;;  %v198_v6 = vld [vmem:[%s1250_s1] sm:$0xff] (!%p138_p2)  ;;  %vm178_vm1 = vcmask (!%p138_p2), 125952  }
   0x7   : > { %174 = vst.msk [vmem:[#allocation2 + $0x10] sm:$0xff] (!%p138_p2), %vm171_vm0, %v1111_v5  ;;  %175 = vst.msk [vmem:[#allocation2 + $0x18] sm:$0xff] (!%p138_p2), %vm171_vm0, %v1111_v5  ;;  %v199_v7 = vld [vmem:[%s1250_s1 + $0x8] sm:$0xff] (!%p138_p2)  ;;  %v1168_v8 = vpack.c.bf16 (!%p138_p2), %v916_v4, %v915_v2  ;;  %v923_v10 = vld [vmem:[%s1250_s1 + $0x30] sm:$0xff] (!%p138_p2)  ;;  %vm832_vm2 = vcmask (!%p138_p2), 261120  }
   0x8   : > { %176 = vst.msk [vmem:[#allocation2 + $0x20] sm:$0xff] (!%p138_p2), %vm171_vm0, %v1111_v5  ;;  %177 = vst.msk [vmem:[#allocation2 + $0x28] sm:$0xff] (!%p138_p2), %vm171_vm0, %v1111_v5  ;;  %v1051_v9 = vpack.c.bf16 (!%p138_p2), %v199_v7, %v198_v6  ;;  %v924_v11 = vld [vmem:[%s1250_s1 + $0x38] sm:$0xff] (!%p138_p2)  ;;  %1048 = vmatprep.subr.bf16.mxu1 (!%p138_p2), %v1047_v3  ;;  %v931_v19 = vld [vmem:[%s1250_s1 + $0x40] sm:$0xff] (!%p138_p2) }
   0x9   : > { %179 = vst.msk [vmem:[#allocation2 + $0x30] sm:$0xf] (!%p138_p2), %vm178_vm1, %v1111_v5  ;;  %v1059_v12 = vpack.c.bf16 (!%p138_p2), %v924_v11, %v923_v10  ;;  %1056 = vmatprep.subr.bf16.mxu0 (!%p138_p2), %v1168_v8  ;;  %1050 = vmatpush3.bf16.msra.mxu1 (!%p138_p2), %v1047_v3  ;;  %v932_v20 = vld [vmem:[%s1250_s1 + $0x48] sm:$0xff] (!%p138_p2)  ;;  %v939_v55 = vld [vmem:[%s1251_s2] ss:$0 sm:$0xff] (!%p138_p2) }
   0xa   : > { %1058 = vmatpush3.bf16.msra.mxu0 (!%p138_p2), %v1168_v8  ;;  %1052 = vmatprep.subr.bf16.mxu1 (!%p138_p2), %v1051_v9  ;;  %v1063_v26 = vpack.c.bf16 (!%p138_p2), %v932_v20, %v931_v19 }
   0xb   : > { %1060 = vmatprep.subr.bf16.mxu0 (!%p138_p2), %v1059_v12 }
   0xd   : > { %s1255_s13 = smov (!%p1149_p3, %s894_s13), 1 }
   0xe   : > { %s1093_s4 = smul.u32 48, %s1255_s13 }
  0x10   : > { %s165_s7 = scalar_lea.vmem %s1249_s0, %s1093_s4  ;;  %s170_s18 = scalar_lea.vmem %s1252_s3, %s1093_s4 }
  0x11   : > { %v180_v13 = vld [vmem:[%s165_s7] sm:$0xff]  ;;  %v181_v14 = vld [vmem:[%s165_s7 + $0x8] sm:$0xff]  ;;  %v182_v15 = vld [vmem:[%s165_s7 + $0x10] sm:$0xff] }
  0x12   : > { %186 = vst.msk [vmem:[#allocation2 + $0x2] sm:$0xff] %vm171_vm0, %v180_v13  ;;  %187 = vst.msk [vmem:[#allocation2 + $0xa] sm:$0xff] %vm171_vm0, %v181_v14  ;;  %v183_v16 = vld [vmem:[%s165_s7 + $0x18] sm:$0xff]  ;;  %v184_v17 = vld [vmem:[%s165_s7 + $0x20] sm:$0xff] }
  0x13   : > { %188 = vst.msk [vmem:[#allocation2 + $0x12] sm:$0xff] %vm171_vm0, %v182_v15  ;;  %v185_v18 = vld [vmem:[%s165_s7 + $0x28] sm:$0xff]  ;;  %189 = vst.msk [vmem:[#allocation2 + $0x1a] sm:$0xff] %vm171_vm0, %v183_v16 }
  0x14   : > { %190 = vst.msk [vmem:[#allocation2 + $0x22] sm:$0xff] %vm171_vm0, %v184_v17  ;;  %191 = vst.msk [vmem:[#allocation2 + $0x2a] sm:$0xff] %vm171_vm0, %v185_v18 }
  0x19   : > { %v200_v21 = vld [vmem:[#allocation2 + $0x1] sm:$0xff]  ;;  %v201_v23 = vld [vmem:[#allocation2 + $0x9] sm:$0xff] }
  0x1a   : > { %v435_v22 = vld [vmem:[#allocation2 + $0x2] sm:$0xff]  ;;  %986 = vmatprep.mubr.msk.f32.mxu1 %vm171_vm0, %v200_v21  ;;  %v436_v24 = vld [vmem:[#allocation2 + $0xa] sm:$0xff]  ;;  %v203_v28 = vld [vmem:[#allocation2 + $0x19] sm:$0xff] }
  0x1b   : > { %1012 = vmatprep.mubr.msk.f32.mxu0 %vm171_vm0, %v435_v22  ;;  %v202_v25 = vld [vmem:[#allocation2 + $0x11] sm:$0xff]  ;;  %987 = vmatmul.mubr.msk.f32.vlgmr.msra.gmra.mrb[0].mxu1 %vm171_vm0, %v201_v23  ;;  %v563_v27 = vld [vmem:[#allocation2 + $0x3] sm:$0xff]  ;;  %v566_v35 = vld [vmem:[#allocation2 + $0x1b] sm:$0xff] }
  0x1c   : > { %1013 = vmatmul.mubr.msk.f32.vlgmr.msra.gmra.mrb[0].mxu0 %vm171_vm0, %v436_v24  ;;  %1054 = vmatpush3.bf16.msra.mxu1 %v1051_v9  ;;  %v204_v29 = vld [vmem:[#allocation2 + $0x21] sm:$0xff]  ;;  %v205_v30 = vld [vmem:[#allocation2 + $0x29] sm:$0xff]  ;;  %v565_v33 = vld [vmem:[#allocation2 + $0x13] sm:$0xff] }
  0x1d   : > { %1062 = vmatpush3.bf16.msra.mxu0 %v1059_v12  ;;  %989 = vmatprep.mubr.msk.f32.mxu1 %vm171_vm0, %v202_v25  ;;  %v564_v31 = vld [vmem:[#allocation2 + $0xb] sm:$0xff]  ;;  %v192_v32 = vld [vmem:[#allocation2] sm:$0xff]  ;;  %v195_v38 = vld [vmem:[#allocation2 + $0x18] sm:$0xff] }
  0x1e   : > { %1025 = vmatprep.mubr.msk.f32.mxu0 %vm171_vm0, %v563_v27  ;;  %1064 = vmatprep.subr.bf16.mxu0 %v1063_v26  ;;  %v193_v34 = vld [vmem:[#allocation2 + $0x8] sm:$0xff]  ;;  %v194_v36 = vld [vmem:[#allocation2 + $0x10] sm:$0xff]  ;;  %v196_v40 = vld [vmem:[#allocation2 + $0x20] sm:$0xff] }
  0x1f   : > { %1067 = vmatprep.subr.bf16.mxu1 %v1168_v8  ;;  %990 = vmatmul.mubr.msk.f32.gmra.mrb[2].mxu1 %vm171_vm0, %v203_v28  ;;  %v567_v37 = vld [vmem:[#allocation2 + $0x23] sm:$0xff]  ;;  %v568_v39 = vld [vmem:[#allocation2 + $0x2b] sm:$0xff]  ;;  %v693_v45 = vld [vmem:[#allocation2 + $0x14] sm:$0xff] }
  0x20   : > { %992 = vmatprep.mubr.msk.f32.mxu1 %vm171_vm0, %v204_v29  ;;  %v691_v41 = vld [vmem:[#allocation2 + $0x4] sm:$0xff]  ;;  %v692_v43 = vld [vmem:[#allocation2 + $0xc] sm:$0xff]  ;;  %v438_v46 = vld [vmem:[#allocation2 + $0x1a] sm:$0xff] }
  0x21   : > { %v197_v42 = vld [vmem:[#allocation2 + $0x28] sm:$0xff]  ;;  %v437_v44 = vld [vmem:[#allocation2 + $0x12] sm:$0xff]  ;;  %v694_v47 = vld [vmem:[#allocation2 + $0x1c] sm:$0xff] }
  0x22   : > { %v439_v48 = vld [vmem:[#allocation2 + $0x22] sm:$0xff]  ;;  %v440_v50 = vld [vmem:[#allocation2 + $0x2a] sm:$0xff] }
  0x23   : > { %993 = vmatmul.mubr.msk.f32.gmra.mrb[4].mxu1 %vm171_vm0, %v205_v30  ;;  %v695_v49 = vld [vmem:[#allocation2 + $0x24] sm:$0xff]  ;;  %v696_v51 = vld [vmem:[#allocation2 + $0x2c] sm:$0xff] }
  0x24   : > { %1026 = vmatmul.mubr.msk.f32.vlgmr.msra.gmra.mrb[0].mxu0 %vm171_vm0, %v564_v31  ;;  %999 = vmatprep.mubr.msk.f32.mxu1 %vm171_vm0, %v192_v32 }
  0x25   : > { %1066 = vmatpush3.bf16.msra.mxu0 %v1063_v26  ;;  %1028 = vmatprep.mubr.msk.f32.mxu0 %vm171_vm0, %v565_v33 }
  0x27   : > { %1000 = vmatmul.mubr.msk.f32.vlgmr.msra.gmra.mrb[0].mxu1 %vm171_vm0, %v193_v34 }
  0x28   : > { %1029 = vmatmul.mubr.msk.f32.gmra.mrb[2].mxu0 %vm171_vm0, %v566_v35  ;;  %1068 = vmatpush3.bf16.msra.mxu1 %v1168_v8 }
  0x29   : > { %1002 = vmatprep.mubr.msk.f32.mxu1 %vm171_vm0, %v194_v36  ;;  %1031 = vmatprep.mubr.msk.f32.mxu0 %vm171_vm0, %v567_v37 }
  0x2b   : > { %1003 = vmatmul.mubr.msk.f32.gmra.mrb[2].mxu1 %vm171_vm0, %v195_v38 }
  0x2c   : > { %1032 = vmatmul.mubr.msk.f32.gmra.mrb[4].mxu0 %vm171_vm0, %v568_v39  ;;  %1005 = vmatprep.mubr.msk.f32.mxu1 %vm171_vm0, %v196_v40 }
  0x2d   : > { %1038 = vmatprep.mubr.msk.f32.mxu0 %vm171_vm0, %v691_v41 }
  0x2f   : > { %1006 = vmatmul.mubr.msk.f32.gmra.mrb[4].mxu1 %vm171_vm0, %v197_v42 }
  0x30   : > { %1039 = vmatmul.mubr.msk.f32.vlgmr.msra.gmra.mrb[0].mxu0 %vm171_vm0, %v692_v43  ;;  %1015 = vmatprep.mubr.msk.f32.mxu1 %vm171_vm0, %v437_v44 }
  0x31   : > { %1041 = vmatprep.mubr.msk.f32.mxu0 %vm171_vm0, %v693_v45 }
  0x33   : > { %1016 = vmatmul.mubr.msk.f32.vlgmr.msra.gmra.mrb[2].mxu1 %vm171_vm0, %v438_v46 }
  0x34   : > { %1042 = vmatmul.mubr.msk.f32.gmra.mrb[2].mxu0 %vm171_vm0, %v694_v47  ;;  %1018 = vmatprep.mubr.msk.f32.mxu1 %vm171_vm0, %v439_v48 }
  0x35   : > { %1044 = vmatprep.mubr.msk.f32.mxu0 %vm171_vm0, %v695_v49 }
  0x37   : > { %1019 = vmatmul.mubr.msk.f32.gmra.mrb[4].mxu1 %vm171_vm0, %v440_v50 }
  0x38   : > { %1045 = vmatmul.mubr.msk.f32.gmra.mrb[4].mxu0 %vm171_vm0, %v696_v51 }
  0xfa   : > { %v1001_v52 = vpop.f32.mrb[0].mxu1 }
  0xfb   : > { %v406_v53 = vpop.f32.mrb[1].mxu1 }
 0x103   : > { %v1040_v54 = vpop.f32.mrb[0].mxu0 }
 0x104   : > { %v1069_v56 = vadd.f32 %v1040_v54, %v1001_v52  ;;  %v784_v57 = vpop.f32.mrb[1].mxu0 }
 0x105   : > { %v1070_v58 = vadd.f32 %v784_v57, %v406_v53 }
 0x106   : > { %v827_v59 = vadd.f32 %v1069_v56, %v939_v55  ;;  %v1017_v61 = vpop.f32.mrb[2].mxu1 }
 0x107   : > { %v826_v60 = vadd.f32 %v1070_v58, %v939_v55  ;;  %v1043_v62 = vpop.f32.mrb[2].mxu0  ;;  %v538_v0 = vpop.f32.mrb[3].mxu1 }
 0x108   : > { %834 = vst.msk [vmem:[%s170_s18 + $0x8] sm:$0xff] %vm832_vm2, %v827_v59  ;;  %v1071_v63 = vadd.f32 %v1043_v62, %v1017_v61  ;;  %v794_v1 = vpop.f32.mrb[3].mxu0 }
 0x109   : > { %833 = vst.msk [vmem:[%s170_s18] sm:$0xff] %vm832_vm2, %v826_v60  ;;  %v1072_v2 = vadd.f32 %v794_v1, %v538_v0 }
 0x10a   : > { %v829_v3 = vadd.f32 %v1071_v63, %v939_v55  ;;  %v1020_v5 = vpop.f32.mrb[4].mxu1 }
 0x10b   : > { %v828_v4 = vadd.f32 %v1072_v2, %v939_v55  ;;  %v1046_v6 = vpop.f32.mrb[4].mxu0  ;;  %v548_v8 = vpop.f32.mrb[5].mxu1 }
 0x10c   : > { %836 = vst.msk [vmem:[%s170_s18 + $0x18] sm:$0xff] %vm832_vm2, %v829_v3  ;;  %v1073_v7 = vadd.f32 %v1046_v6, %v1020_v5  ;;  %v804_v9 = vpop.f32.mrb[5].mxu0 }
 0x10d   : > { %835 = vst.msk [vmem:[%s170_s18 + $0x10] sm:$0xff] %vm832_vm2, %v828_v4  ;;  %v1074_v10 = vadd.f32 %v804_v9, %v548_v8 }
 0x10e   : > { %v831_v11 = vadd.f32 %v1073_v7, %v939_v55 }
 0x10f   : > { %v830_v12 = vadd.f32 %v1074_v10, %v939_v55 }
 0x110   : > { %838 = vst.msk [vmem:[%s170_s18 + $0x28] sm:$0xff] %vm832_vm2, %v831_v11 }
 0x111   : > { %837 = vst.msk [vmem:[%s170_s18 + $0x20] sm:$0xff] %vm832_vm2, %v830_v12 }
 0x112 PF: > { %s13_s12 = sadd.s32 1, %s1109_s12  }
 0x113   : > { %p10_p4 = scmp.ge.s32.totalorder %s13_s12, 4  }
 0x115   :  { %12 = sbr.rel (!%p10_p4) target bundleno = 1 (0x1), region = 66 }

</bundles_post_ra>
